<compile_context>
chip_gen: v6e
topology: v6e:2x2x1
jax: 0.10.0
libtpu: 0.0.40
codegen_flags: <defaults>
</compile_context>

<pallas_src>
import jax
import jax.numpy as jnp
from jax import lax
from jax.experimental import pallas as pl
from jax.experimental.pallas import tpu as pltpu


def _round_up(x, m):
    return (x + m - 1) // m * m


def gcn_encoder_kernel(adj_ref, feat_ref, w_ref, fcw_ref, out_ref, acc_ref, deg_ref):
    """Grid = (batch tiles i, neighbor tiles k); k is the reduction axis."""
    k = pl.program_id(1)

    @pl.when(k == 0)
    def _init():
        acc_ref[...] = jnp.zeros_like(acc_ref)
        deg_ref[...] = jnp.zeros_like(deg_ref)

    adj = adj_ref[...]        # (TB, TN) bf16 0/1 sampled-neighbor mask (incl. self loop)
    feats = feat_ref[...]     # (TN, Fp) bf16 node-feature tile

    # Un-normalized mean aggregation: accumulate adj-tile @ feature-tile and the degree.
    acc_ref[...] += jnp.dot(adj, feats, preferred_element_type=jnp.float32)    # (TB, Fp)
    deg_ref[...] += jnp.sum(adj.astype(jnp.float32), axis=-1, keepdims=True)   # (TB, 1)

    @pl.when(k == pl.num_programs(1) - 1)
    def _finalize():
        w = w_ref[...]        # (E, Fp)  == nn.Parameter(embed_dim, feat_dim)
        fcw = fcw_ref[...]    # (Fp, E)  == nn.Linear(embed_dim, feat_dim).weight

        # h = agg @ W.T  (contract the feature dim; avoids explicit transposes).
        h = lax.dot_general(acc_ref[...], w, (((1,), (1,)), ((), ())),
                            preferred_element_type=jnp.float32)                # (TB, E)
        # Deferred degree normalization: relu(x/deg) == relu(x)/deg for deg > 0;
        # applied on the narrow (TB, E) intermediate, approx reciprocal runs on the EUP.
        inv_deg = pl.reciprocal(jnp.maximum(deg_ref[...], 1.0), approx=True)   # (TB, 1)
        h = jnp.maximum(h, 0.0) * inv_deg

        # out = relu(h @ fc_weight.T)  (contract the embed dim).
        out = lax.dot_general(h, fcw, (((1,), (1,)), ((), ())),
                              preferred_element_type=jnp.float32)              # (TB, Fp)
        out_ref[...] = jnp.maximum(out, 0.0).astype(out_ref.dtype)


def gcn_encoder_forward(adj_mask, features, weight, fc_weight, *,
                        batch_tile=128, neigh_tile=512):
    B, N = adj_mask.shape
    N2, F = features.shape
    E, F2 = weight.shape
    assert N2 == N and F2 == F and fc_weight.shape == (F, E)

    TB = batch_tile
    TN = min(neigh_tile, _round_up(N, 128))
    Fp = _round_up(F, 128)
    Bp = _round_up(B, TB)
    Np = _round_up(N, TN)

    # Pad + cast streamed operands to bf16 (0/1 mask is exact in bf16); pad weights in f32.
    adj_p = jnp.pad(adj_mask.astype(jnp.bfloat16), ((0, Bp - B), (0, Np - N)))
    feat_p = jnp.pad(features.astype(jnp.bfloat16), ((0, Np - N), (0, Fp - F)))
    w_p = jnp.pad(weight.astype(jnp.float32), ((0, 0), (0, Fp - F)))
    fcw_p = jnp.pad(fc_weight.astype(jnp.float32), ((0, Fp - F), (0, 0)))

    grid = (Bp // TB, Np // TN)

    # Advisory cost hint for the XLA scheduler.
    flops = 2 * Bp * Np * Fp + 2 * Bp * Fp * E + 2 * Bp * E * Fp
    bytes_accessed = (adj_p.size * 2 + feat_p.size * 2 * grid[0]
                      + w_p.size * 4 + fcw_p.size * 4 + Bp * Fp * 4)
    cost = pl.CostEstimate(flops=int(flops), transcendentals=0,
                           bytes_accessed=int(bytes_accessed))

    # Per-step VMEM working set (double-buffered inputs/output + resident weights + scratch),
    # kept under v7x's 64 MiB physical VMEM.
    vmem_bytes = (2 * (TB * TN * 2 + TN * Fp * 2 + TB * Fp * 4)
                  + 2 * (E * Fp * 4 + Fp * E * 4)
                  + TB * Fp * 4 + TB * 128 * 4)
    vmem_limit = int(min(max(2 * vmem_bytes, 32 * 1024 * 1024), 64 * 1024 * 1024))

    out_padded = pl.pallas_call(
        gcn_encoder_kernel,
        out_shape=jax.ShapeDtypeStruct((Bp, Fp), jnp.float32),
        grid_spec=pltpu.PrefetchScalarGridSpec(
            num_scalar_prefetch=0,
            grid=grid,
            in_specs=[
                pl.BlockSpec((TB, TN), lambda i, k: (i, k)),   # adjacency tile
                pl.BlockSpec((TN, Fp), lambda i, k: (k, 0)),   # feature-table tile
                pl.BlockSpec((E, Fp), lambda i, k: (0, 0)),    # W           (resident)
                pl.BlockSpec((Fp, E), lambda i, k: (0, 0)),    # fc.weight   (resident)
            ],
            out_specs=pl.BlockSpec((TB, Fp), lambda i, k: (i, 0)),
            scratch_shapes=[
                pltpu.VMEM((TB, Fp), jnp.float32),   # aggregation accumulator
                pltpu.VMEM((TB, 1), jnp.float32),    # degree accumulator
            ],
        ),
        compiler_params=pltpu.CompilerParams(
            dimension_semantics=("parallel", "arbitrary"),
            vmem_limit_bytes=vmem_limit,
        ),
        cost_estimate=cost,
    )(adj_p, feat_p, w_p, fcw_p)

    return out_padded[:B, :F]


def reference_forward(adj_mask, features, weight, fc_weight):
    deg = jnp.maximum(adj_mask.sum(-1, keepdims=True), 1.0)
    neigh = (adj_mask @ features) / deg
    combined = jax.nn.relu(weight @ neigh.T)          # (E, B)
    out = jax.nn.relu(combined.T @ fc_weight.T)       # (B, F)
    return out


if __name__ == "__main__":
    key = jax.random.PRNGKey(0)
    k_feat, k_adj, k_w, k_fc = jax.random.split(key, 4)

    num_total_nodes = 64   # N : nodes in the graph / feature table
    feat_dim = 128         # F
    embed_dim = 32         # E
    batch_nodes = 8        # B : nodes in this forward batch

    # Node feature table (stands in for `self.features`).
    features = jax.random.normal(k_feat, (num_total_nodes, feat_dim), dtype=jnp.float32)

    # Deterministic neighbor-sample mask (stands in for aggregator sampling of adj_lists,
    # num_sample=10); include a self loop so every row has degree >= 1.
    adj_mask = (jax.random.uniform(k_adj, (batch_nodes, num_total_nodes)) < 0.15)
    adj_mask = adj_mask.at[jnp.arange(batch_nodes), jnp.arange(batch_nodes)].set(True)
    adj_mask = adj_mask.astype(jnp.float32)

    # Parameters (deterministic synthetic init matching the module's shapes).
    # self.weight: (embed_dim, feat_dim), xavier_uniform_
    bound_w = (6.0 / (embed_dim + feat_dim)) ** 0.5
    weight = jax.random.uniform(k_w, (embed_dim, feat_dim), jnp.float32, -bound_w, bound_w)
    # self.fc = nn.Linear(embed_dim, feat_dim, bias=False): weight shape (feat_dim, embed_dim)
    bound_fc = (1.0 / embed_dim) ** 0.5
    fc_weight = jax.random.uniform(k_fc, (feat_dim, embed_dim), jnp.float32, -bound_fc, bound_fc)

    out = gcn_encoder_forward(adj_mask, features, weight, fc_weight)
    out = jax.block_until_ready(out)

    ref = reference_forward(adj_mask, features, weight, fc_weight)
    assert out.shape == (batch_nodes, feat_dim)
    # bf16 streaming + approx reciprocal -> allow ~1e-2-level deviation vs the f32 reference.
    assert jnp.allclose(out, ref, atol=2e-2, rtol=2e-2)

    print("KERNEL_OK")
</pallas_src>

<mosaic_0001>
module attributes {stable_mosaic.version = 11 : i64} {
  func.func @gcn_encoder_kernel(%arg0: i32, %arg1: i32, %arg2: memref<128x128xbf16, #tpu.memory_space<vmem>>, %arg3: memref<128x128xbf16, #tpu.memory_space<vmem>>, %arg4: memref<32x128xf32, #tpu.memory_space<vmem>>, %arg5: memref<128x32xf32, #tpu.memory_space<vmem>>, %arg6: memref<128x128xf32, #tpu.memory_space<vmem>>, %arg7: memref<128x128xf32, #tpu.memory_space<vmem>>, %arg8: memref<128x1xf32, #tpu.memory_space<vmem>>) attributes {dimension_semantics = [#tpu.dimension_semantics<parallel>, #tpu.dimension_semantics<arbitrary>], iteration_bounds = array<i64: 1, 1>, scalar_prefetch = 0 : i64, scratch_operands = 2 : i64, tpu.core_type = #tpu.core_type<tc>, window_params = [{transform_indices = @transform_0, window_bounds = array<i64: 128, 128>}, {transform_indices = @transform_1, window_bounds = array<i64: 128, 128>}, {pipeline_mode = #tpu.pipeline_mode<synchronous>, transform_indices = @transform_2, window_bounds = array<i64: 32, 128>}, {pipeline_mode = #tpu.pipeline_mode<synchronous>, transform_indices = @transform_3, window_bounds = array<i64: 128, 32>}, {transform_indices = @transform_4, window_bounds = array<i64: 128, 128>}]} {
    %c0_i32 = arith.constant 0 : i32
    %0 = arith.cmpi eq, %arg1, %c0_i32 : i32
    %1 = arith.extui %0 : i1 to i32
    %c0_i32_0 = arith.constant 0 : i32
    %2 = arith.cmpi ne, %1, %c0_i32_0 : i32
    scf.if %2 {
      %cst_15 = arith.constant 0.000000e+00 : f32
      %18 = vector.broadcast %cst_15 : f32 to vector<128x128xf32>
      %c0_16 = arith.constant 0 : index
      %c0_17 = arith.constant 0 : index
      %19 = vector.load %arg7[%c0_16, %c0_17] : memref<128x128xf32, #tpu.memory_space<vmem>>, vector<128x128xf32>
      tpu.vector_store %arg7[%c0_16, %c0_17], %18 {strides = array<i32>} : memref<128x128xf32, #tpu.memory_space<vmem>>, vector<128x128xf32>,
      %cst_18 = arith.constant 0.000000e+00 : f32
      %20 = vector.broadcast %cst_18 : f32 to vector<128x1xf32>
      %c0_19 = arith.constant 0 : index
      %c0_20 = arith.constant 0 : index
      %21 = vector.load %arg8[%c0_19, %c0_20] : memref<128x1xf32, #tpu.memory_space<vmem>>, vector<128x1xf32>
      tpu.vector_store %arg8[%c0_19, %c0_20], %20 {strides = array<i32>} : memref<128x1xf32, #tpu.memory_space<vmem>>, vector<128x1xf32>,
    } else {
    }
    %c0 = arith.constant 0 : index
    %c0_1 = arith.constant 0 : index
    %3 = vector.load %arg2[%c0, %c0_1] : memref<128x128xbf16, #tpu.memory_space<vmem>>, vector<128x128xbf16>
    %c0_2 = arith.constant 0 : index
    %c0_3 = arith.constant 0 : index
    %4 = vector.load %arg3[%c0_2, %c0_3] : memref<128x128xbf16, #tpu.memory_space<vmem>>, vector<128x128xbf16>
    %c0_4 = arith.constant 0 : index
    %c0_5 = arith.constant 0 : index
    %5 = vector.load %arg7[%c0_4, %c0_5] : memref<128x128xf32, #tpu.memory_space<vmem>>, vector<128x128xf32>
    %cst = arith.constant dense<0.000000e+00> : vector<128x128xf32>
    %6 = tpu.matmul %3, %4, %cst {dimension_numbers = #tpu.dot_dimension_numbers<[1], [0], [0], [1], [0, 0, 1, 1], [], []>} : vector<128x128xbf16>, vector<128x128xbf16>, vector<128x128xf32> -> vector<128x128xf32>
    %7 = arith.addf %5, %6 : vector<128x128xf32>
    %c0_6 = arith.constant 0 : index
    %c0_7 = arith.constant 0 : index
    %8 = vector.load %arg7[%c0_6, %c0_7] : memref<128x128xf32, #tpu.memory_space<vmem>>, vector<128x128xf32>
    tpu.vector_store %arg7[%c0_6, %c0_7], %7 {strides = array<i32>} : memref<128x128xf32, #tpu.memory_space<vmem>>, vector<128x128xf32>,
    %c0_8 = arith.constant 0 : index
    %c0_9 = arith.constant 0 : index
    %9 = vector.load %arg8[%c0_8, %c0_9] : memref<128x1xf32, #tpu.memory_space<vmem>>, vector<128x1xf32>
    %10 = arith.extf %3 : vector<128x128xbf16> to vector<128x128xf32>
    %cst_10 = arith.constant dense<0.000000e+00> : vector<128xf32>
    %11 = vector.multi_reduction <add>, %10, %cst_10 [1] : vector<128x128xf32> to vector<128xf32>
    %12 = vector.shape_cast %11 : vector<128xf32> to vector<128x1xf32>
    %13 = arith.addf %9, %12 : vector<128x1xf32>
    %c0_11 = arith.constant 0 : index
    %c0_12 = arith.constant 0 : index
    %14 = vector.load %arg8[%c0_11, %c0_12] : memref<128x1xf32, #tpu.memory_space<vmem>>, vector<128x1xf32>
    tpu.vector_store %arg8[%c0_11, %c0_12], %13 {strides = array<i32>} : memref<128x1xf32, #tpu.memory_space<vmem>>, vector<128x1xf32>,
    %c0_i32_13 = arith.constant 0 : i32
    %15 = arith.cmpi eq, %arg1, %c0_i32_13 : i32
    %16 = arith.extui %15 : i1 to i32
    %c0_i32_14 = arith.constant 0 : i32
    %17 = arith.cmpi ne, %16, %c0_i32_14 : i32
    scf.if %17 {
      %c0_15 = arith.constant 0 : index
      %c0_16 = arith.constant 0 : index
      %18 = vector.load %arg4[%c0_15, %c0_16] : memref<32x128xf32, #tpu.memory_space<vmem>>, vector<32x128xf32>
      %c0_17 = arith.constant 0 : index
      %c0_18 = arith.constant 0 : index
      %19 = vector.load %arg5[%c0_17, %c0_18] : memref<128x32xf32, #tpu.memory_space<vmem>>, vector<128x32xf32>
      %c0_19 = arith.constant 0 : index
      %c0_20 = arith.constant 0 : index
      %20 = vector.load %arg7[%c0_19, %c0_20] : memref<128x128xf32, #tpu.memory_space<vmem>>, vector<128x128xf32>
      %cst_21 = arith.constant dense<0.000000e+00> : vector<128x32xf32>
      %21 = tpu.matmul %20, %18, %cst_21 {dimension_numbers = #tpu.dot_dimension_numbers<[1], [1], [0], [0], [0, 0, 1, 0], [], []>} : vector<128x128xf32>, vector<32x128xf32>, vector<128x32xf32> -> vector<128x32xf32>
      %c0_22 = arith.constant 0 : index
      %c0_23 = arith.constant 0 : index
      %22 = vector.load %arg8[%c0_22, %c0_23] : memref<128x1xf32, #tpu.memory_space<vmem>>, vector<128x1xf32>
      %cst_24 = arith.constant 1.000000e+00 : f32
      %23 = vector.broadcast %cst_24 : f32 to vector<128x1xf32>
      %24 = arith.maximumf %22, %23 : vector<128x1xf32>
      %25 = tpu.reciprocal %24 {approx = true} : vector<128x1xf32> -> vector<128x1xf32>
      %cst_25 = arith.constant 0.000000e+00 : f32
      %26 = vector.broadcast %cst_25 : f32 to vector<128x32xf32>
      %27 = arith.maximumf %21, %26 : vector<128x32xf32>
      %28 = vector.broadcast %25 : vector<128x1xf32> to vector<128x32xf32>
      %29 = arith.mulf %27, %28 : vector<128x32xf32>
      %cst_26 = arith.constant dense<0.000000e+00> : vector<128x128xf32>
      %30 = tpu.matmul %29, %19, %cst_26 {dimension_numbers = #tpu.dot_dimension_numbers<[1], [1], [0], [0], [0, 0, 1, 0], [], []>} : vector<128x32xf32>, vector<128x32xf32>, vector<128x128xf32> -> vector<128x128xf32>
      %cst_27 = arith.constant 0.000000e+00 : f32
      %31 = vector.broadcast %cst_27 : f32 to vector<128x128xf32>
      %32 = arith.maximumf %30, %31 : vector<128x128xf32>
      %c0_28 = arith.constant 0 : index
      %c0_29 = arith.constant 0 : index
      %33 = vector.load %arg6[%c0_28, %c0_29] : memref<128x128xf32, #tpu.memory_space<vmem>>, vector<128x128xf32>
      tpu.vector_store %arg6[%c0_28, %c0_29], %32 {strides = array<i32>} : memref<128x128xf32, #tpu.memory_space<vmem>>, vector<128x128xf32>,
    } else {
    }
    return
  }
  func.func @transform_0(%arg0: i32, %arg1: i32) -> (i32, i32) {
    %c0_i32 = arith.constant 0 : i32
    return %arg0, %arg1 : i32, i32
  }
  func.func @transform_1(%arg0: i32, %arg1: i32) -> (i32, i32) {
    %c0_i32 = arith.constant 0 : i32
    %c0_i32_0 = arith.constant 0 : i32
    return %arg1, %c0_i32 : i32, i32
  }
  func.func @transform_2(%arg0: i32, %arg1: i32) -> (i32, i32) {
    %c0_i32 = arith.constant 0 : i32
    %c0_i32_0 = arith.constant 0 : i32
    %c0_i32_1 = arith.constant 0 : i32
    return %c0_i32, %c0_i32_0 : i32, i32
  }
  func.func @transform_3(%arg0: i32, %arg1: i32) -> (i32, i32) {
    %c0_i32 = arith.constant 0 : i32
    %c0_i32_0 = arith.constant 0 : i32
    %c0_i32_1 = arith.constant 0 : i32
    return %c0_i32, %c0_i32_0 : i32, i32
  }
  func.func @transform_4(%arg0: i32, %arg1: i32) -> (i32, i32) {
    %c0_i32 = arith.constant 0 : i32
    %c0_i32_0 = arith.constant 0 : i32
    return %arg0, %c0_i32 : i32, i32
  }
}

</mosaic_0001>

<bundles_post_ra>
// kernel: tpu_custom_call.1
= control target key start
LH: loop header
LB: loop body
LE: loop exit
PB: predicated region body
PF: predicated region fallthrough
CT: control target
= control target key end

     0   :  { %s1612_s0 = inlined_call_operand.vmem [shape: bf16[128,128], index: 0, kind: input, shape index: {}]   ;;  %s1613_s1 = inlined_call_operand.vmem [shape: bf16[128,128], index: 1, kind: input, shape index: {}]   ;;  %s1614_s2 = inlined_call_operand.vmem [shape: f32[32,128], index: 2, kind: input, shape index: {}]   ;;  %s1615_s3 = inlined_call_operand.vmem [shape: f32[128,32], index: 3, kind: input, shape index: {}]   ;;  %s1616_s4 = inlined_call_operand.hbm [shape: f32[128,128], index: 4, kind: output, shape index: {}]  }
   0x1   :  { %v1303_v0 = vld [vmem:[%s1613_s1 + $0x38] sm:$0xff]   ;;  %v1304_v1 = vld [vmem:[%s1613_s1 + $0x30] sm:$0xff]   ;;  %v1305_v2 = vld [vmem:[%s1613_s1 + $0x28] sm:$0xff]  }
   0x2   :  { %1176 = vmatprep.subr.bf16.mxu0 %v1303_v0  ;;  %v1306_v3 = vld [vmem:[%s1613_s1 + $0x20] sm:$0xff]   ;;  %v1429_v6 = vld [vmem:[%s1612_s0 + $0x8] sm:$0xff]  }
   0x3   :  { %1177 = vmatpush3.bf16.msra.mxu0 %v1303_v0  ;;  %v56_v4 = vld [vmem:[%s1612_s0] sm:$0xff]   ;;  %v347_v7 = vunpack.c.l.bf16 %v1429_v6 }
   0x4   :  { %1178 = vmatprep.subr.bf16.mxu0 %v1304_v1  ;;  %v345_v5 = vunpack.c.l.bf16 %v56_v4  ;;  %1192 = vmatprep.mubr.bf16.mxu0 %v56_v4 }
   0x7   :  { %1179 = vmatpush3.bf16.msra.mxu0 %v1304_v1 }
   0x8   :  { %1180 = vmatprep.subr.bf16.mxu0 %v1305_v2 }
   0xb   :  { %1181 = vmatpush3.bf16.msra.mxu0 %v1305_v2 }
   0xc   :  { %9 = vsyncpa [#allocation5], 0  ;;  %1182 = vmatprep.subr.bf16.mxu0 %v1306_v3  ;;  %v1307_v8 = vld [vmem:[%s1613_s1 + $0x18] sm:$0xff]   ;;  %361 = vadd.xlane.f32.xlu0 %v345_v5  ;;  %v346_v9 = vunpack.c.h.bf16 %v56_v4  ;;  %v348_v10 = vunpack.c.h.bf16 %v1429_v6  ;;  %v60_v11 = vld [vmem:[%s1612_s0 + $0x10] sm:$0xff]   ;;  %vm39_vm0 = vcmask 7168   ;;  %v1381_v19 = vmov 0.0  }
   0xd   :  { %365 = vadd.xlane.f32.xlu1 %v347_v7  ;;  %v1308_v12 = vld [vmem:[%s1613_s1 + $0x10] sm:$0xff]   ;;  %v349_v13 = vunpack.c.l.bf16 %v60_v11  ;;  %v350_v14 = vunpack.c.h.bf16 %v60_v11  ;;  %v1445_v15 = vld [vmem:[%s1612_s0 + $0x18] sm:$0xff]   ;;  %v1309_v16 = vld [vmem:[%s1613_s1 + $0x8] sm:$0xff]   ;;  %40 = vst.msk [vmem:[#allocation3] sm:$0xff] %vm39_vm0, %v1381_v19  ;;  %v1382_v37 = vmov 0   ;;  %vm770_vm1 = vcmask 261120  }
   0xe   :  { %v351_v17 = vunpack.c.l.bf16 %v1445_v15  ;;  %v352_v18 = vunpack.c.h.bf16 %v1445_v15  ;;  %41 = vst.msk [vmem:[#allocation3 + $0x8] sm:$0xff] %vm39_vm0, %v1381_v19  ;;  %42 = vst.msk [vmem:[#allocation3 + $0x10] sm:$0xff] %vm39_vm0, %v1381_v19  ;;  %v64_v20 = vld [vmem:[%s1612_s0 + $0x20] sm:$0xff]   ;;  %v66_v24 = vld [vmem:[%s1612_s0 + $0x28] sm:$0xff]   ;;  %1302 = vset.pattern.permute.xlu1 %v1382_v37  ;;  %1301 = vset.pattern.permute.xlu0 %v1382_v37 }
   0xf   :  { %1183 = vmatpush3.bf16.msra.mxu0 %v1306_v3  ;;  %43 = vst.msk [vmem:[#allocation3 + $0x18] sm:$0xff] %vm39_vm0, %v1381_v19  ;;  %44 = vst.msk [vmem:[#allocation3 + $0x20] sm:$0xff] %vm39_vm0, %v1381_v19  ;;  %v1310_v21 = vld [vmem:[%s1613_s1] sm:$0xff]   ;;  %v353_v22 = vunpack.c.l.bf16 %v64_v20  ;;  %v354_v23 = vunpack.c.h.bf16 %v64_v20  ;;  %v355_v25 = vunpack.c.l.bf16 %v66_v24  ;;  %v356_v26 = vunpack.c.h.bf16 %v66_v24  ;;  %v432_v27 = vld [vmem:[%s1614_s2 + $0x18] sm:$0xff] }
  0x10   :  { %1184 = vmatprep.subr.bf16.mxu0 %v1307_v8  ;;  %363 = vadd.xlane.f32.xlu0 %v346_v9  ;;  %45 = vst.msk [vmem:[#allocation3 + $0x28] sm:$0xff] %vm39_vm0, %v1381_v19  ;;  %46 = vst.msk [vmem:[#allocation3 + $0x30] sm:$0xff] %vm39_vm0, %v1381_v19  ;;  %v68_v28 = vld [vmem:[%s1612_s0 + $0x30] sm:$0xff]   ;;  %v70_v32 = vld [vmem:[%s1612_s0 + $0x38] sm:$0xff]  }
  0x11   :  { %367 = vadd.xlane.f32.xlu1 %v348_v10  ;;  %47 = vst.msk [vmem:[#allocation3 + $0x38] sm:$0xff] %vm39_vm0, %v1381_v19  ;;  %48 = vst.msk [vmem:[#allocation3 + $0x40] sm:$0xff] %vm39_vm0, %v1381_v19  ;;  %v357_v29 = vunpack.c.l.bf16 %v68_v28  ;;  %v358_v30 = vunpack.c.h.bf16 %v68_v28  ;;  %v431_v31 = vld [vmem:[%s1614_s2 + $0x10] sm:$0xff]  ;;  %v359_v33 = vunpack.c.l.bf16 %v70_v32  ;;  %v360_v34 = vunpack.c.h.bf16 %v70_v32  ;;  %v430_v35 = vld [vmem:[%s1614_s2 + $0x8] sm:$0xff] }
  0x12   :  { %49 = vst.msk [vmem:[#allocation3 + $0x48] sm:$0xff] %vm39_vm0, %v1381_v19  ;;  %50 = vst.msk [vmem:[#allocation3 + $0x50] sm:$0xff] %vm39_vm0, %v1381_v19  ;;  %v429_v36 = vld [vmem:[%s1614_s2] sm:$0xff]  ;;  %v448_v38 = vld [vmem:[%s1615_s3 + $0x78] sm:$0xff] }
  0x13   :  { %1185 = vmatpush3.bf16.msra.mxu0 %v1307_v8  ;;  %51 = vst.msk [vmem:[#allocation3 + $0x58] sm:$0xff] %vm39_vm0, %v1381_v19  ;;  %52 = vst.msk [vmem:[#allocation3 + $0x60] sm:$0xff] %vm39_vm0, %v1381_v19  ;;  %v447_v39 = vld [vmem:[%s1615_s3 + $0x70] sm:$0xff]  ;;  %1240 = vmatprep.subr.msk.mxu1 %vm770_vm1, %v448_v38  ;;  %v446_v40 = vld [vmem:[%s1615_s3 + $0x68] sm:$0xff] }
  0x14   :  { %1186 = vmatprep.subr.bf16.mxu0 %v1308_v12  ;;  %369 = vadd.xlane.f32.xlu0 %v349_v13  ;;  %53 = vst.msk [vmem:[#allocation3 + $0x68] sm:$0xff] %vm39_vm0, %v1381_v19  ;;  %54 = vst.msk [vmem:[#allocation3 + $0x70] sm:$0xff] %vm39_vm0, %v1381_v19  ;;  %v329_v41 = vld [vmem:[#allocation3] sm:$0xff] }
  0x15   :  { %371 = vadd.xlane.f32.xlu1 %v350_v14  ;;  %55 = vst.msk [vmem:[#allocation3 + $0x78] sm:$0xff] %vm39_vm0, %v1381_v19  ;;  %1241 = vmatpush3.xpose.msk.msra.mxu1 %vm770_vm1, %v448_v38  ;;  %v331_v42 = vld [vmem:[#allocation3 + $0x10] sm:$0xff]  ;;  %v330_v46 = vld [vmem:[#allocation3 + $0x8] sm:$0xff] }
  0x16   :  { %1242 = vmatprep.subr.msk.mxu1 %vm770_vm1, %v447_v39  ;;  %v332_v48 = vld [vmem:[#allocation3 + $0x18] sm:$0xff]  ;;  %v333_v53 = vld [vmem:[#allocation3 + $0x20] sm:$0xff] }
  0x17   :  { %1187 = vmatpush3.bf16.msra.mxu0 %v1308_v12  ;;  %v334_v54 = vld [vmem:[#allocation3 + $0x28] sm:$0xff]  ;;  %v335_v59 = vld [vmem:[#allocation3 + $0x30] sm:$0xff] }
  0x18   :  { %1188 = vmatprep.subr.bf16.mxu0 %v1309_v16  ;;  %373 = vadd.xlane.f32.xlu0 %v351_v17  ;;  %v336_v61 = vld [vmem:[#allocation3 + $0x38] sm:$0xff]  ;;  %v337_v5 = vld [vmem:[#allocation3 + $0x40] sm:$0xff] }
  0x19   :  { %375 = vadd.xlane.f32.xlu1 %v352_v18  ;;  %1243 = vmatpush3.xpose.msk.msra.mxu1 %vm770_vm1, %v447_v39  ;;  %v338_v8 = vld [vmem:[#allocation3 + $0x48] sm:$0xff]  ;;  %v339_v13 = vld [vmem:[#allocation3 + $0x50] sm:$0xff] }
  0x1a   :  { %1244 = vmatprep.subr.msk.mxu1 %vm770_vm1, %v446_v40 }
  0x1b   :  { %1189 = vmatpush3.bf16.msra.mxu0 %v1309_v16  ;;  %v340_v16 = vld [vmem:[#allocation3 + $0x58] sm:$0xff] }
  0x1c   :  { %1190 = vmatprep.subr.bf16.mxu0 %v1310_v21  ;;  %377 = vadd.xlane.f32.xlu0 %v353_v22 }
  0x1d   :  { %379 = vadd.xlane.f32.xlu1 %v354_v23  ;;  %1245 = vmatpush3.xpose.msk.msra.mxu1 %vm770_vm1, %v446_v40 }
  0x1f   :  { %1191 = vmatpush3.bf16.msra.mxu0 %v1310_v21  ;;  %v341_v21 = vld [vmem:[#allocation3 + $0x60] sm:$0xff] }
  0x20   :  { %381 = vadd.xlane.f32.xlu0 %v355_v25  ;;  %1208 = vmatprep.subr.mxu0 %v432_v27 }
  0x21   :  { %383 = vadd.xlane.f32.xlu1 %v356_v26 }
  0x22   :  { %1193 = vmatmul.mubr.bf16.vlgmr.msra.gmra.mxu0 %v1429_v6 }
  0x23   :  { %1196 = vmatprep.mubr.bf16.mxu0 %v60_v11  ;;  %1209 = vmatpush3.xpose.msra.mxu0 %v432_v27 }
  0x24   :  { %385 = vadd.xlane.f32.xlu0 %v357_v29  ;;  %1210 = vmatprep.subr.mxu0 %v431_v31 }
  0x25   :  { %387 = vadd.xlane.f32.xlu1 %v358_v30  ;;  %v343_v30 = vld [vmem:[#allocation3 + $0x70] sm:$0xff] }
  0x27   :  { %1211 = vmatpush3.xpose.msra.mxu0 %v431_v31 }
  0x28   :  { %389 = vadd.xlane.f32.xlu0 %v359_v33  ;;  %1212 = vmatprep.subr.mxu0 %v430_v35 }
  0x29   :  { %391 = vadd.xlane.f32.xlu1 %v360_v34  ;;  %v344_v34 = vld [vmem:[#allocation3 + $0x78] sm:$0xff] }
  0x2a   :  { %1197 = vmatmul.mubr.bf16.gmra.mxu0 %v1445_v15 }
  0x2b   :  { %1200 = vmatprep.mubr.bf16.mxu0 %v64_v20  ;;  %1213 = vmatpush3.xpose.msra.mxu0 %v430_v35 }
  0x2c   :  { %1214 = vmatprep.subr.mxu0 %v429_v36 }
  0x2f   :  { %1215 = vmatpush3.xpose.msra.mxu0 %v429_v36 }
  0x32   :  { %1201 = vmatmul.mubr.bf16.gmra.mxu0 %v66_v24  ;;  %v342_v24 = vld [vmem:[#allocation3 + $0x68] sm:$0xff] }
  0x33   :  { %1204 = vmatprep.mubr.bf16.mxu0 %v68_v28 }
  0x3a   :  { %1205 = vmatmul.mubr.bf16.gmra.mxu0 %v70_v32  ;;  %v445_v32 = vld [vmem:[%s1615_s3 + $0x60] sm:$0xff] }
  0x3b   :  { %1246 = vmatprep.subr.msk.mxu1 %vm770_vm1, %v445_v32 }
  0x3c   :  { %1247 = vmatpush3.xpose.msk.msra.mxu1 %vm770_vm1, %v445_v32 }
  0x95   :  { %v362_v43 = vpop.xlane.xlu0 %361 }
  0x96   :  { %v393_v44 = vadd.f32 %v362_v43, %v329_v41  ;;  %v366_v45 = vpop.xlane.xlu1 %365  ;;  %v444_v43 = vld [vmem:[%s1615_s3 + $0x58] sm:$0xff] }
  0x97   :  { %v395_v47 = vadd.f32 %v366_v45, %v331_v42  ;;  %1248 = vmatprep.subr.msk.mxu1 %vm770_vm1, %v444_v43 }
  0x98   :  { %410 = vst.msk [vmem:[#allocation3] sm:$0xff] %vm39_vm0, %v393_v44  ;;  %1249 = vmatpush3.xpose.msk.msra.mxu1 %vm770_vm1, %v444_v43 }
  0x99   :  { %v364_v49 = vpop.xlane.xlu0 %363  ;;  %412 = vst.msk [vmem:[#allocation3 + $0x10] sm:$0xff] %vm39_vm0, %v395_v47 }
  0x9a   :  { %v394_v50 = vadd.f32 %v364_v49, %v330_v46  ;;  %v368_v51 = vpop.xlane.xlu1 %367  ;;  %v443_v49 = vld [vmem:[%s1615_s3 + $0x50] sm:$0xff] }
  0x9b   :  { %v396_v52 = vadd.f32 %v368_v51, %v332_v48  ;;  %1250 = vmatprep.subr.msk.mxu1 %vm770_vm1, %v443_v49 }
  0x9c   :  { %411 = vst.msk [vmem:[#allocation3 + $0x8] sm:$0xff] %vm39_vm0, %v394_v50  ;;  %1251 = vmatpush3.xpose.msk.msra.mxu1 %vm770_vm1, %v443_v49 }
  0x9d   :  { %413 = vst.msk [vmem:[#allocation3 + $0x18] sm:$0xff] %vm39_vm0, %v396_v52  ;;  %v370_v55 = vpop.xlane.xlu0 %369 }
  0x9e   :  { %v397_v56 = vadd.f32 %v370_v55, %v333_v53  ;;  %v372_v57 = vpop.xlane.xlu1 %371  ;;  %v442_v55 = vld [vmem:[%s1615_s3 + $0x48] sm:$0xff] }
  0x9f   :  { %v398_v58 = vadd.f32 %v372_v57, %v334_v54  ;;  %v610_v60 = vld [vmem:[#allocation3] sm:$0xff]  ;;  %1252 = vmatprep.subr.msk.mxu1 %vm770_vm1, %v442_v55 }
  0xa0   :  { %414 = vst.msk [vmem:[#allocation3 + $0x20] sm:$0xff] %vm39_vm0, %v397_v56  ;;  %v626_v62 = vmax.f32 %v610_v60, 1.0  ;;  %v612_v0 = vld [vmem:[#allocation3 + $0x10] sm:$0xff]  ;;  %1253 = vmatpush3.xpose.msk.msra.mxu1 %vm770_vm1, %v442_v55 }
  0xa1   :  { %415 = vst.msk [vmem:[#allocation3 + $0x28] sm:$0xff] %vm39_vm0, %v398_v58  ;;  %v374_v63 = vpop.xlane.xlu0 %373  ;;  %v628_v7 = vmax.f32 %v612_v0, 1.0 }
  0xa2   :  { %v399_v1 = vadd.f32 %v374_v63, %v335_v59  ;;  %v376_v2 = vpop.xlane.xlu1 %375  ;;  %1327 = vrcp.f32 %v626_v62 }
  0xa3   :  { %v400_v3 = vadd.f32 %v376_v2, %v336_v61  ;;  %v611_v4 = vld [vmem:[#allocation3 + $0x8] sm:$0xff]  ;;  %v441_v61 = vld [vmem:[%s1615_s3 + $0x40] sm:$0xff]  ;;  %v440_v2 = vld [vmem:[%s1615_s3 + $0x38] sm:$0xff] }
  0xa4   :  { %416 = vst.msk [vmem:[#allocation3 + $0x30] sm:$0xff] %vm39_vm0, %v399_v1  ;;  %v627_v6 = vmax.f32 %v611_v4, 1.0  ;;  %v613_v10 = vld [vmem:[#allocation3 + $0x18] sm:$0xff]  ;;  %1254 = vmatprep.subr.msk.mxu1 %vm770_vm1, %v441_v61 }
  0xa5   :  { %417 = vst.msk [vmem:[#allocation3 + $0x38] sm:$0xff] %vm39_vm0, %v400_v3  ;;  %v378_v9 = vpop.xlane.xlu0 %377  ;;  %v629_v15 = vmax.f32 %v613_v10, 1.0  ;;  %1255 = vmatpush3.xpose.msk.msra.mxu1 %vm770_vm1, %v441_v61 }
  0xa6   :  { %1329 = vrcp.f32 %v627_v6  ;;  %v401_v11 = vadd.f32 %v378_v9, %v337_v5  ;;  %v380_v12 = vpop.xlane.xlu1 %379  ;;  %1256 = vmatprep.subr.msk.mxu1 %vm770_vm1, %v440_v2 }
  0xa7   :  { %v402_v14 = vadd.f32 %v380_v12, %v338_v8  ;;  %1331 = vrcp.f32 %v628_v7  ;;  %v614_v18 = vld [vmem:[#allocation3 + $0x20] sm:$0xff]  ;;  %v439_v7 = vld [vmem:[%s1615_s3 + $0x30] sm:$0xff] }
  0xa8   :  { %418 = vst.msk [vmem:[#allocation3 + $0x40] sm:$0xff] %vm39_vm0, %v401_v11  ;;  %1333 = vrcp.f32 %v629_v15  ;;  %v630_v23 = vmax.f32 %v614_v18, 1.0  ;;  %v615_v26 = vld [vmem:[#allocation3 + $0x28] sm:$0xff]  ;;  %v435_v18 = vld [vmem:[%s1615_s3 + $0x10] sm:$0xff] }
  0xa9   :  { %v382_v17 = vpop.xlane.xlu0 %381  ;;  %419 = vst.msk [vmem:[#allocation3 + $0x48] sm:$0xff] %vm39_vm0, %v402_v14  ;;  %v631_v33 = vmax.f32 %v615_v26, 1.0  ;;  %1257 = vmatpush3.xpose.msk.msra.mxu1 %vm770_vm1, %v440_v2  ;;  %v438_v11 = vld [vmem:[%s1615_s3 + $0x28] sm:$0xff]  ;;  %v437_v14 = vld [vmem:[%s1615_s3 + $0x20] sm:$0xff] }
  0xaa   :  { %v403_v19 = vadd.f32 %v382_v17, %v339_v13  ;;  %v384_v20 = vpop.xlane.xlu1 %383  ;;  %1335 = vrcp.f32 %v630_v23  ;;  %1258 = vmatprep.subr.msk.mxu1 %vm770_vm1, %v439_v7 }
  0xab   :  { %v404_v22 = vadd.f32 %v384_v20, %v340_v16  ;;  %v616_v37 = vld [vmem:[#allocation3 + $0x30] sm:$0xff]  ;;  %v436_v16 = vld [vmem:[%s1615_s3 + $0x18] sm:$0xff] }
  0xac   :  { %420 = vst.msk [vmem:[#allocation3 + $0x50] sm:$0xff] %vm39_vm0, %v403_v19  ;;  %v632_v44 = vmax.f32 %v616_v37, 1.0  ;;  %v617_v47 = vld [vmem:[#allocation3 + $0x38] sm:$0xff]  ;;  %v433_v37 = vld [vmem:[%s1615_s3] sm:$0xff] }
  0xad   :  { %v386_v25 = vpop.xlane.xlu0 %385  ;;  %421 = vst.msk [vmem:[#allocation3 + $0x58] sm:$0xff] %vm39_vm0, %v404_v22  ;;  %v633_v50 = vmax.f32 %v617_v47, 1.0  ;;  %1259 = vmatpush3.xpose.msk.msra.mxu1 %vm770_vm1, %v439_v7 }
  0xae   :  { %v405_v27 = vadd.f32 %v386_v25, %v341_v21  ;;  %v388_v28 = vpop.xlane.xlu1 %387  ;;  %1260 = vmatprep.subr.msk.mxu1 %vm770_vm1, %v438_v11 }
  0xaf   :  { %v1328_v29 = vpop.eup %1327  ;;  %v406_v31 = vadd.f32 %v388_v28, %v342_v24  ;;  %v618_v53 = vld [vmem:[#allocation3 + $0x40] sm:$0xff] }
  0xb0   :  { %422 = vst.msk [vmem:[#allocation3 + $0x60] sm:$0xff] %vm39_vm0, %v405_v27  ;;  %676 = vperm.xlu0 %1301, %v1328_v29   ;;  %v619_v35 = vld [vmem:[#allocation3 + $0x48] sm:$0xff]  ;;  %v634_v56 = vmax.f32 %v618_v53, 1.0 }
  0xb1   :  { %v390_v36 = vpop.xlane.xlu0 %389  ;;  %423 = vst.msk [vmem:[#allocation3 + $0x68] sm:$0xff] %vm39_vm0, %v406_v31  ;;  %v635_v38 = vmax.f32 %v619_v35, 1.0  ;;  %1261 = vmatpush3.xpose.msk.msra.mxu1 %vm770_vm1, %v438_v11 }
  0xb2   :  { %v407_v39 = vadd.f32 %v390_v36, %v343_v30  ;;  %v392_v40 = vpop.xlane.xlu1 %391  ;;  %1262 = vmatprep.subr.msk.mxu1 %vm770_vm1, %v437_v14  ;;  %v434_v36 = vld [vmem:[%s1615_s3 + $0x8] sm:$0xff]  ;;  %s1383_s3 = smov [#allocation4]  }
  0xb3   :  { %v1330_v41 = vpop.eup %1329  ;;  %v408_v42 = vadd.f32 %v392_v40, %v344_v34  ;;  %1337 = vrcp.f32 %v635_v38  ;;  %v620_v59 = vld [vmem:[#allocation3 + $0x50] sm:$0xff]  ;;  %s1049_s30 = sshll.u32 %s1383_s3, 4  ;;  %s1050_s30 = int_to_ptr.vmem [resolvable:$true] %s1049_s30 }
  0xb4   :  { %681 = vperm.xlu1 %1302, %v1330_v41   ;;  %424 = vst.msk [vmem:[#allocation3 + $0x70] sm:$0xff] %vm39_vm0, %v407_v39  ;;  %1339 = vrcp.f32 %v631_v33  ;;  %v621_v45 = vld [vmem:[#allocation3 + $0x58] sm:$0xff]  ;;  %v1332_v46 = vpop.eup %1331  ;;  %v636_v63 = vmax.f32 %v620_v59, 1.0  ;;  %s1359_s2 = scalar_lea.vmem %s1050_s30, 2048  ;;  %p1364_p1 = scmp.lt.s32.totalorder %s1050_s30, %s1050_s30 }
  0xb5   :  { %425 = vst.msk [vmem:[#allocation3 + $0x78] sm:$0xff] %vm39_vm0, %v408_v42  ;;  %v637_v48 = vmax.f32 %v621_v45, 1.0  ;;  %v1334_v52 = vpop.eup %1333  ;;  %1263 = vmatpush3.xpose.msk.msra.mxu1 %vm770_vm1, %v437_v14  ;;  %p1360_p0 = scmp.ne.s32.totalorder %s1050_s30, %s1359_s2  ;;  %p1365_p2 = scmp.lt.s32.totalorder %s1359_s2, %s1359_s2 }
  0xb6   :  { %1264 = vmatprep.subr.msk.mxu1 %vm770_vm1, %v436_v16 }
  0xb7   :  { %1341 = vrcp.f32 %v637_v48  ;;  %v1336_v58 = vpop.eup %1335  ;;  %v622_v1 = vld [vmem:[#allocation3 + $0x60] sm:$0xff]  ;;  %p1366_p3 = por %p1365_p2, %p1364_p1 }
  0xb8   :  { %686 = vperm.xlu1 %1302, %v1332_v46   ;;  %1343 = vrcp.f32 %v632_v44  ;;  %v623_v51 = vld [vmem:[#allocation3 + $0x68] sm:$0xff]  ;;  %v638_v4 = vmax.f32 %v622_v1, 1.0 }
  0xb9   :  { %v639_v54 = vmax.f32 %v623_v51, 1.0  ;;  %1265 = vmatpush3.xpose.msk.msra.mxu1 %vm770_vm1, %v436_v16  ;;  %p1367_p4 = pnand %p1366_p3, %p1360_p0 }
  0xba   :  { %1266 = vmatprep.subr.msk.mxu1 %vm770_vm1, %v435_v18 }
  0xbb   :  { %1345 = vrcp.f32 %v639_v54  ;;  %v624_v6 = vld [vmem:[#allocation3 + $0x70] sm:$0xff] }
  0xbc   :  { %691 = vperm.xlu1 %1302, %v1334_v52   ;;  %1347 = vrcp.f32 %v633_v50  ;;  %v625_v57 = vld [vmem:[#allocation3 + $0x78] sm:$0xff]  ;;  %v640_v9 = vmax.f32 %v624_v6, 1.0 }
  0xbd   :  { %v641_v60 = vmax.f32 %v625_v57, 1.0  ;;  %1267 = vmatpush3.xpose.msk.msra.mxu1 %vm770_vm1, %v435_v18 }
  0xbe   :  { %1268 = vmatprep.subr.msk.mxu1 %vm770_vm1, %v434_v36 }
  0xbf   :  { %1349 = vrcp.f32 %v641_v60 }
  0xc0   :  { %v1338_v62 = vpop.eup %1337  ;;  %696 = vperm.xlu1 %1302, %v1336_v58   ;;  %1351 = vrcp.f32 %v634_v56 }
  0xc1   :  { %v1340_v0 = vpop.eup %1339  ;;  %721 = vperm.xlu0 %1301, %v1338_v62   ;;  %1353 = vrcp.f32 %v636_v63  ;;  %1269 = vmatpush3.xpose.msk.msra.mxu1 %vm770_vm1, %v434_v36 }
  0xc2   :  { %1355 = vrcp.f32 %v638_v4  ;;  %1270 = vmatprep.subr.msk.mxu1 %vm770_vm1, %v433_v37 }
  0xc3   :  { %1357 = vrcp.f32 %v640_v9 }
  0xc4   :  { %v1342_v3 = vpop.eup %1341  ;;  %701 = vperm.xlu1 %1302, %v1340_v0  }
  0xc5   :  { %v1344_v5 = vpop.eup %1343  ;;  %731 = vperm.xlu0 %1301, %v1342_v3   ;;  %1271 = vmatpush3.xpose.msk.msra.mxu1 %vm770_vm1, %v433_v37 }
  0xc8   :  { %v1346_v8 = vpop.eup %1345  ;;  %706 = vperm.xlu1 %1302, %v1344_v5  }
  0xc9   :  { %v1348_v10 = vpop.eup %1347  ;;  %741 = vperm.xlu0 %1301, %v1346_v8  }
  0xcc   :  { %v1350_v12 = vpop.eup %1349  ;;  %711 = vperm.xlu1 %1302, %v1348_v10  }
  0xcd   :  { %v1352_v13 = vpop.eup %1351  ;;  %751 = vperm.xlu0 %1301, %v1350_v12  }
  0xce   :  { %v1354_v15 = vpop.eup %1353 }
  0xcf   :  { %v1356_v17 = vpop.eup %1355 }
  0xd0   :  { %716 = vperm.xlu1 %1302, %v1352_v13   ;;  %v1358_v19 = vpop.eup %1357 }
  0xd4   :  { %726 = vperm.xlu1 %1302, %v1354_v15  }
  0xd8   :  { %736 = vperm.xlu1 %1302, %v1356_v17  }
  0xdc   :  { %746 = vperm.xlu1 %1302, %v1358_v19  }
  0xe2   :  { %v1194_v20 = vpop.f32.mrf.mxu0 }
  0xe4   :  { %v234_v21 = vpop.f32.mrf.mxu0 }
  0xe5   :  { %1216 = vmatprep.mubr.f32.mxu0 %v234_v21 }
  0xe6   :  { %v1195_v22 = vpop.f32.mrf.mxu0 }
  0xe8   :  { %v237_v23 = vpop.f32.mrf.mxu0 }
  0xe9   :  { %1217 = vmatmul.mubr.f32.vlgmr.msra.gmra.mxu0 %v237_v23 }
  0xea   :  { %v1198_v24 = vpop.f32.mrf.mxu0  ;;  %1219 = vmatprep.mubr.f32.mxu0 %v1194_v20 }
  0xec   :  { %v250_v25 = vpop.f32.mrf.mxu0 }
  0xed   :  { %1220 = vmatmul.mubr.f32.gmra.mxu0 %v1195_v22 }
  0xee   :  { %v1199_v26 = vpop.f32.mrf.mxu0  ;;  %1222 = vmatprep.mubr.f32.mxu0 %v250_v25 }
  0xf0   :  { %v253_v27 = vpop.f32.mrf.mxu0 }
  0xf1   :  { %1223 = vmatmul.mubr.f32.gmra.mxu0 %v253_v27 }
  0xf2   :  { %v1202_v28 = vpop.f32.mrf.mxu0  ;;  %1225 = vmatprep.mubr.f32.mxu0 %v1198_v24 }
  0xf4   :  { %v266_v29 = vpop.f32.mrf.mxu0 }
  0xf5   :  { %1226 = vmatmul.mubr.f32.gmra.mxu0 %v1199_v26 }
  0xf6   :  { %v1203_v30 = vpop.f32.mrf.mxu0  ;;  %1228 = vmatprep.mubr.f32.mxu0 %v266_v29 }
  0xf8   :  { %v269_v31 = vpop.f32.mrf.mxu0 }
  0xf9   :  { %1229 = vmatmul.mubr.f32.gmra.mxu0 %v269_v31 }
  0xfa   :  { %v1206_v32 = vpop.f32.mrf.mxu0  ;;  %1231 = vmatprep.mubr.f32.mxu0 %v1202_v28 }
  0xfc   :  { %v282_v33 = vpop.f32.mrf.mxu0 }
  0xfd   :  { %1232 = vmatmul.mubr.f32.gmra.mxu0 %v1203_v30 }
  0xfe   :  { %v1207_v34 = vpop.f32.mrf.mxu0  ;;  %1234 = vmatprep.mubr.f32.mxu0 %v282_v33 }
 0x100   :  { %v285_v35 = vpop.f32.mrf.mxu0 }
 0x101   :  { %1235 = vmatmul.mubr.f32.gmra.mxu0 %v285_v35 }
 0x102   :  { %1237 = vmatprep.mubr.f32.mxu0 %v1206_v32 }
 0x105   :  { %1238 = vmatmul.mubr.f32.gmra.mxu0 %v1207_v34 }
 0x12b   :  { %v677_v48 = vpop.permute.xlu0 %676 }
 0x12f   :  { %v682_v38 = vpop.permute.xlu1 %681 }
 0x133   :  { %v687_v39 = vpop.permute.xlu1 %686 }
 0x137   :  { %v692_v40 = vpop.permute.xlu1 %691 }
 0x13b   :  { %v697_v41 = vpop.permute.xlu1 %696 }
 0x13c   :  { %v722_v4 = vpop.permute.xlu0 %721 }
 0x13f   :  { %v702_v42 = vpop.permute.xlu1 %701 }
 0x140   :  { %v732_v14 = vpop.permute.xlu0 %731 }
 0x143   :  { %v707_v44 = vpop.permute.xlu1 %706 }
 0x144   :  { %v742_v26 = vpop.permute.xlu0 %741 }
 0x147   :  { %v712_v55 = vpop.permute.xlu1 %711 }
 0x148   :  { %v752_v35 = vpop.permute.xlu0 %751 }
 0x14b   :  { %v717_v0 = vpop.permute.xlu1 %716 }
 0x14f   :  { %v727_v12 = vpop.permute.xlu1 %726 }
 0x153   :  { %v737_v22 = vpop.permute.xlu1 %736 }
 0x157   :  { %v747_v34 = vpop.permute.xlu1 %746 }
 0x1a9   :  { %v1218_v43 = vpop.f32.mrf.mxu0 }
 0x1aa   :  { %v659_v45 = vmax.f32 %v1218_v43, 0.0 }
 0x1ab   :  { %v531_v46 = vpop.f32.mrf.mxu0 }
 0x1ac   :  { %v658_v47 = vmax.f32 %v531_v46, 0.0  ;;  %v755_v51 = vmul.f32 %v682_v38, %v659_v45 }
 0x1ad   :  { %v1221_v49 = vpop.f32.mrf.mxu0 }
 0x1ae   :  { %v754_v50 = vmul.f32 %v677_v48, %v658_v47  ;;  %v661_v52 = vmax.f32 %v1221_v49, 0.0 }
 0x1af   :  { %v541_v53 = vpop.f32.mrf.mxu0 }
 0x1b0   :  { %v660_v54 = vmax.f32 %v541_v53, 0.0  ;;  %1272 = vmatprep.mubr.msk.f32.mxu1 %vm770_vm1, %v754_v50  ;;  %v757_v58 = vmul.f32 %v692_v40, %v661_v52 }
 0x1b1   :  { %v1224_v56 = vpop.f32.mrf.mxu0  ;;  %1273 = vmatmul.mubr.msk.f32.vlgmr.msra.gmra.mxu1 %vm770_vm1, %v755_v51 }
 0x1b2   :  { %v756_v57 = vmul.f32 %v687_v39, %v660_v54  ;;  %v663_v59 = vmax.f32 %v1224_v56, 0.0 }
 0x1b3   :  { %v551_v60 = vpop.f32.mrf.mxu0 }
 0x1b4   :  { %v662_v61 = vmax.f32 %v551_v60, 0.0  ;;  %1275 = vmatprep.mubr.msk.f32.mxu1 %vm770_vm1, %v756_v57  ;;  %v759_v1 = vmul.f32 %v702_v42, %v663_v59 }
 0x1b5   :  { %v1227_v62 = vpop.f32.mrf.mxu0  ;;  %1276 = vmatmul.mubr.msk.f32.gmra.mxu1 %vm770_vm1, %v757_v58 }
 0x1b6   :  { %v758_v63 = vmul.f32 %v697_v41, %v662_v61  ;;  %v665_v2 = vmax.f32 %v1227_v62, 0.0 }
 0x1b7   :  { %v561_v3 = vpop.f32.mrf.mxu0 }
 0x1b8   :  { %v664_v5 = vmax.f32 %v561_v3, 0.0  ;;  %1278 = vmatprep.mubr.msk.f32.mxu1 %vm770_vm1, %v758_v63  ;;  %v761_v8 = vmul.f32 %v712_v55, %v665_v2 }
 0x1b9   :  { %v1230_v6 = vpop.f32.mrf.mxu0  ;;  %1279 = vmatmul.mubr.msk.f32.gmra.mxu1 %vm770_vm1, %v759_v1 }
 0x1ba   :  { %v760_v7 = vmul.f32 %v707_v44, %v664_v5  ;;  %v667_v9 = vmax.f32 %v1230_v6, 0.0 }
 0x1bb   :  { %v571_v10 = vpop.f32.mrf.mxu0 }
 0x1bc   :  { %v666_v11 = vmax.f32 %v571_v10, 0.0  ;;  %1281 = vmatprep.mubr.msk.f32.mxu1 %vm770_vm1, %v760_v7  ;;  %v763_v16 = vmul.f32 %v722_v4, %v667_v9 }
 0x1bd   :  { %v1233_v13 = vpop.f32.mrf.mxu0  ;;  %1282 = vmatmul.mubr.msk.f32.gmra.mxu1 %vm770_vm1, %v761_v8 }
 0x1be   :  { %v762_v15 = vmul.f32 %v717_v0, %v666_v11  ;;  %v669_v17 = vmax.f32 %v1233_v13, 0.0 }
 0x1bf   :  { %v581_v18 = vpop.f32.mrf.mxu0 }
 0x1c0   :  { %v668_v19 = vmax.f32 %v581_v18, 0.0  ;;  %1284 = vmatprep.mubr.msk.f32.mxu1 %vm770_vm1, %v762_v15  ;;  %v765_v23 = vmul.f32 %v732_v14, %v669_v17 }
 0x1c1   :  { %v1236_v20 = vpop.f32.mrf.mxu0  ;;  %1285 = vmatmul.mubr.msk.f32.gmra.mxu1 %vm770_vm1, %v763_v16 }
 0x1c2   :  { %v764_v21 = vmul.f32 %v727_v12, %v668_v19  ;;  %v671_v24 = vmax.f32 %v1236_v20, 0.0 }
 0x1c3   :  { %v591_v25 = vpop.f32.mrf.mxu0 }
 0x1c4   :  { %v670_v27 = vmax.f32 %v591_v25, 0.0  ;;  %1287 = vmatprep.mubr.msk.f32.mxu1 %vm770_vm1, %v764_v21  ;;  %v767_v30 = vmul.f32 %v742_v26, %v671_v24 }
 0x1c5   :  { %v1239_v28 = vpop.f32.mrf.mxu0  ;;  %1288 = vmatmul.mubr.msk.f32.gmra.mxu1 %vm770_vm1, %v765_v23 }
 0x1c6   :  { %v766_v29 = vmul.f32 %v737_v22, %v670_v27  ;;  %v673_v31 = vmax.f32 %v1239_v28, 0.0 }
 0x1c7   :  { %v601_v32 = vpop.f32.mrf.mxu0 }
 0x1c8   :  { %v672_v33 = vmax.f32 %v601_v32, 0.0  ;;  %1290 = vmatprep.mubr.msk.f32.mxu1 %vm770_vm1, %v766_v29  ;;  %v769_v37 = vmul.f32 %v752_v35, %v673_v31 }
 0x1c9   :  { %1291 = vmatmul.mubr.msk.f32.gmra.mxu1 %vm770_vm1, %v767_v30 }
 0x1ca   :  { %v768_v36 = vmul.f32 %v747_v34, %v672_v33 }
 0x1cc   :  { %1293 = vmatprep.mubr.msk.f32.mxu1 %vm770_vm1, %v768_v36 }
 0x1cd   :  { %1294 = vmatmul.mubr.msk.f32.gmra.mxu1 %vm770_vm1, %v769_v37 }
 0x271   :  { %v1274_v38 = vpop.f32.mrf.mxu1 }
 0x272   :  { %v1013_v39 = vmax.f32 %v1274_v38, 0.0 }
 0x273   :  { %v933_v40 = vpop.f32.mrf.mxu1 }
 0x274   :  { %1029 = vst [vmem:[#allocation4 + $0x8] sm:$0xff] %v1013_v39  ;;  %v1012_v41 = vmax.f32 %v933_v40, 0.0 }
 0x275   :  { %v1277_v42 = vpop.f32.mrf.mxu1 }
 0x276   :  { %1028 = vst [vmem:[#allocation4] sm:$0xff] %v1012_v41  ;;  %v1015_v43 = vmax.f32 %v1277_v42, 0.0 }
 0x277   :  { %v943_v44 = vpop.f32.mrf.mxu1 }
 0x278   :  { %1031 = vst [vmem:[#allocation4 + $0x18] sm:$0xff] %v1015_v43  ;;  %v1014_v45 = vmax.f32 %v943_v44, 0.0 }
 0x279   :  { %v1280_v46 = vpop.f32.mrf.mxu1 }
 0x27a   :  { %1030 = vst [vmem:[#allocation4 + $0x10] sm:$0xff] %v1014_v45  ;;  %v1017_v47 = vmax.f32 %v1280_v46, 0.0 }
 0x27b   :  { %v953_v48 = vpop.f32.mrf.mxu1 }
 0x27c   :  { %1033 = vst [vmem:[#allocation4 + $0x28] sm:$0xff] %v1017_v47  ;;  %v1016_v49 = vmax.f32 %v953_v48, 0.0 }
 0x27d   :  { %v1283_v50 = vpop.f32.mrf.mxu1 }
 0x27e   :  { %1032 = vst [vmem:[#allocation4 + $0x20] sm:$0xff] %v1016_v49  ;;  %v1019_v51 = vmax.f32 %v1283_v50, 0.0 }
 0x27f   :  { %v963_v52 = vpop.f32.mrf.mxu1 }
 0x280   :  { %1035 = vst [vmem:[#allocation4 + $0x38] sm:$0xff] %v1019_v51  ;;  %v1018_v53 = vmax.f32 %v963_v52, 0.0 }
 0x281   :  { %v1286_v54 = vpop.f32.mrf.mxu1 }
 0x282   :  { %1034 = vst [vmem:[#allocation4 + $0x30] sm:$0xff] %v1018_v53  ;;  %v1021_v55 = vmax.f32 %v1286_v54, 0.0 }
 0x283   :  { %v973_v56 = vpop.f32.mrf.mxu1 }
 0x284   :  { %1037 = vst [vmem:[#allocation4 + $0x48] sm:$0xff] %v1021_v55  ;;  %v1020_v57 = vmax.f32 %v973_v56, 0.0 }
 0x285   :  { %v1289_v58 = vpop.f32.mrf.mxu1 }
 0x286   :  { %1036 = vst [vmem:[#allocation4 + $0x40] sm:$0xff] %v1020_v57  ;;  %v1023_v59 = vmax.f32 %v1289_v58, 0.0 }
 0x287   :  { %v983_v60 = vpop.f32.mrf.mxu1 }
 0x288   :  { %1039 = vst [vmem:[#allocation4 + $0x58] sm:$0xff] %v1023_v59  ;;  %v1022_v61 = vmax.f32 %v983_v60, 0.0 }
 0x289   :  { %v1292_v62 = vpop.f32.mrf.mxu1 }
 0x28a   :  { %1038 = vst [vmem:[#allocation4 + $0x50] sm:$0xff] %v1022_v61  ;;  %v1025_v63 = vmax.f32 %v1292_v62, 0.0 }
 0x28b   :  { %v993_v0 = vpop.f32.mrf.mxu1 }
 0x28c   :  { %1041 = vst [vmem:[#allocation4 + $0x68] sm:$0xff] %v1025_v63  ;;  %v1024_v1 = vmax.f32 %v993_v0, 0.0 }
 0x28d   :  { %v1295_v2 = vpop.f32.mrf.mxu1 }
 0x28e   :  { %1040 = vst [vmem:[#allocation4 + $0x60] sm:$0xff] %v1024_v1  ;;  %v1027_v3 = vmax.f32 %v1295_v2, 0.0 }
 0x28f   :  { %v1003_v4 = vpop.f32.mrf.mxu1 }
 0x290   :  { %1043 = vst [vmem:[#allocation4 + $0x78] sm:$0xff] %v1027_v3  ;;  %v1026_v5 = vmax.f32 %v1003_v4, 0.0 }
 0x292   :  { %1042 = vst [vmem:[#allocation4 + $0x70] sm:$0xff] %v1026_v5 }
 0x293   :  { %1370 = shalt.err (!%p1367_p4)
}
 0x294   :  { %s1384_s5 = smov 128   ;;  %s1385_s6 = smov 8  }
 0x295   :  { %1055 = dma.vmem_to_hbm [thread:$0]  %s1050_s30, 2048, %s1616_s4, [#allocation5], %s1384_s5, %s1384_s5, %s1385_s6  }
 0x296   :  { %1379 = dma.done.wait [#allocation5], 2048  }
 0x297   :  { %1380 = vsyncadd [#allocation5], 4294965248 }
 0x298   :  { %1059 = vsyncpa [#allocation5], 1 }

</bundles_post_ra>
